<compile_context>
chip_gen: v6e
topology: v6e:2x2x1
jax: 0.10.0
libtpu: 0.0.40
codegen_flags: <defaults>
</compile_context>

<pallas_src>
import numpy as np
import jax
import jax.numpy as jnp
from jax import lax
from jax.experimental import pallas as pl
from jax.experimental.pallas import tpu as pltpu

_LANE = 128
_SUBLANE = 8


def _round_up(x, m):
    return (x + m - 1) // m * m


def _vmem_limit_bytes():
    # ~3/4 of the local generation's physical VMEM; conservative fallback.
    try:
        return int(0.75 * pltpu.get_tpu_info().vmem_capacity_bytes)
    except Exception:
        return 48 * 1024 * 1024


# ---------------------------------------------------------------------------
# Pallas kernel: (TM, K)bf16 @ (K, N)bf16 -> f32 acc, fused BN(eval) + ReLU
# ---------------------------------------------------------------------------
def _matmul_bn_relu_kernel(x_ref, w_ref, scale_ref, shift_ref, o_ref):
    acc = jnp.dot(x_ref[...], w_ref[...], preferred_element_type=jnp.float32)
    y = acc * scale_ref[...] + shift_ref[...]          # folded BatchNorm + bias
    o_ref[...] = jnp.maximum(y, 0.0).astype(o_ref.dtype)   # ReLU


def _conv3x3_bn_relu(x_nhwc, w_hwio, scale, shift, *, out_dtype, tm=256):
    """x_nhwc: (B,H,W,Cin_p); w_hwio: (3,3,Cin_p,Cout_p) f32; scale/shift: (Cout_p,).
    Returns (B,H,W,Cout_p) in out_dtype.  Channel dims must already be padded."""
    B, H, W, Cin_p = x_nhwc.shape
    Cout_p = w_hwio.shape[-1]
    K = 9 * Cin_p

    # im2col in XLA (review option (b)): 9 shifted copies concatenated on the
    # lane (channel) axis -> a single aligned matmul per row tile in the kernel.
    xp = jnp.pad(x_nhwc, ((0, 0), (1, 1), (1, 1), (0, 0)))
    patches = jnp.concatenate(
        [xp[:, di:di + H, dj:dj + W, :] for di in range(3) for dj in range(3)],
        axis=-1)                                        # (B, H, W, 9*Cin_p)
    lhs = patches.reshape(B * H * W, K).astype(jnp.bfloat16)

    R = B * H * W
    tm = min(tm, _round_up(R, _SUBLANE))
    R_pad = _round_up(R, tm)
    if R_pad != R:
        lhs = jnp.pad(lhs, ((0, R_pad - R), (0, 0)))

    w2 = w_hwio.reshape(K, Cout_p).astype(jnp.bfloat16)
    scale2 = scale.reshape(1, Cout_p).astype(jnp.float32)
    shift2 = shift.reshape(1, Cout_p).astype(jnp.float32)

    out = pl.pallas_call(
        _matmul_bn_relu_kernel,
        out_shape=jax.ShapeDtypeStruct((R_pad, Cout_p), out_dtype),
        grid=(R_pad // tm,),
        in_specs=[pl.BlockSpec((tm, K), lambda i: (i, 0)),
                  pl.BlockSpec((K, Cout_p), lambda i: (0, 0)),
                  pl.BlockSpec((1, Cout_p), lambda i: (0, 0)),
                  pl.BlockSpec((1, Cout_p), lambda i: (0, 0))],
        out_specs=pl.BlockSpec((tm, Cout_p), lambda i: (i, 0)),
        compiler_params=pltpu.CompilerParams(
            dimension_semantics=("parallel",),
            vmem_limit_bytes=_vmem_limit_bytes()),
    )(lhs, w2, scale2, shift2)

    return out[:R].reshape(B, H, W, Cout_p)


# ---------------------------------------------------------------------------
# Parameters (deterministic, synthetic) + BN folding
# ---------------------------------------------------------------------------
def init_double_conv_params(key, in_channels, out_channels):
    ks = jax.random.split(key, 8)
    s = 0.1
    p = {}
    # Conv weights stored HWIO (3,3,Cin,Cout) (== torch weight.transpose(2,3,1,0))
    p["c1_w"] = s * jax.random.normal(ks[0], (3, 3, in_channels, out_channels), jnp.float32)
    p["c1_b"] = s * jax.random.normal(ks[1], (out_channels,), jnp.float32)
    p["bn1_g"] = 1.0 + 0.1 * jax.random.normal(ks[2], (out_channels,), jnp.float32)
    p["bn1_b"] = 0.1 * jax.random.normal(ks[3], (out_channels,), jnp.float32)
    p["bn1_mean"] = jnp.zeros((out_channels,), jnp.float32)   # default running stats
    p["bn1_var"] = jnp.ones((out_channels,), jnp.float32)
    p["c2_w"] = s * jax.random.normal(ks[4], (3, 3, out_channels, out_channels), jnp.float32)
    p["c2_b"] = s * jax.random.normal(ks[5], (out_channels,), jnp.float32)
    p["bn2_g"] = 1.0 + 0.1 * jax.random.normal(ks[6], (out_channels,), jnp.float32)
    p["bn2_b"] = 0.1 * jax.random.normal(ks[7], (out_channels,), jnp.float32)
    p["bn2_mean"] = jnp.zeros((out_channels,), jnp.float32)
    p["bn2_var"] = jnp.ones((out_channels,), jnp.float32)
    return p


def _fuse_bn(gamma, beta, mean, var, conv_bias, eps=1e-5):
    scale = gamma / jnp.sqrt(var + eps)
    shift = (conv_bias - mean) * scale + beta
    return scale, shift


# ---------------------------------------------------------------------------
# DoubleConv.forward
# ---------------------------------------------------------------------------
def double_conv_forward(params, x_nchw, *, tm=256):
    x = jnp.transpose(x_nchw, (0, 2, 3, 1))             # NCHW -> NHWC
    B, H, W, Cin = x.shape
    Cout = params["c1_w"].shape[-1]

    Cin_p = _round_up(Cin, _SUBLANE)
    Cout_p = _round_up(Cout, _LANE)

    # Stage 1: pad weight / fused-BN params to lane-dense channel counts (zeros).
    w1 = jnp.pad(params["c1_w"],
                 ((0, 0), (0, 0), (0, Cin_p - Cin), (0, Cout_p - Cout)))
    s1, t1 = _fuse_bn(params["bn1_g"], params["bn1_b"], params["bn1_mean"],
                      params["bn1_var"], params["c1_b"])
    s1 = jnp.pad(s1, (0, Cout_p - Cout))
    t1 = jnp.pad(t1, (0, Cout_p - Cout))

    # Stage 2: input channels are the (zero-padded) stage-1 outputs.
    w2 = jnp.pad(params["c2_w"],
                 ((0, 0), (0, 0), (0, Cout_p - Cout), (0, Cout_p - Cout)))
    s2, t2 = _fuse_bn(params["bn2_g"], params["bn2_b"], params["bn2_mean"],
                      params["bn2_var"], params["c2_b"])
    s2 = jnp.pad(s2, (0, Cout_p - Cout))
    t2 = jnp.pad(t2, (0, Cout_p - Cout))

    x_p = jnp.pad(x, ((0, 0), (0, 0), (0, 0), (0, Cin_p - Cin))).astype(jnp.bfloat16)
    h1 = _conv3x3_bn_relu(x_p, w1, s1, t1, out_dtype=jnp.bfloat16, tm=tm)
    h2 = _conv3x3_bn_relu(h1, w2, s2, t2, out_dtype=jnp.float32, tm=tm)

    return jnp.transpose(h2[..., :Cout], (0, 3, 1, 2))   # crop pad, back to NCHW


# ---------------------------------------------------------------------------
# Pure-JAX reference (independent of the Pallas implementation, full f32)
# ---------------------------------------------------------------------------
def ref_forward(params, x_nchw, eps=1e-5):
    x = jnp.transpose(x_nchw, (0, 2, 3, 1))

    def conv_bn_relu(x, w, b, g, beta, mean, var):
        y = lax.conv_general_dilated(
            x, w, (1, 1), "SAME",
            dimension_numbers=("NHWC", "HWIO", "NHWC")) + b
        y = g * (y - mean) / jnp.sqrt(var + eps) + beta
        return jnp.maximum(y, 0.0)

    h1 = conv_bn_relu(x, params["c1_w"], params["c1_b"], params["bn1_g"],
                      params["bn1_b"], params["bn1_mean"], params["bn1_var"])
    h2 = conv_bn_relu(h1, params["c2_w"], params["c2_b"], params["bn2_g"],
                      params["bn2_b"], params["bn2_mean"], params["bn2_var"])
    return jnp.transpose(h2, (0, 3, 1, 2))


# ---------------------------------------------------------------------------
if __name__ == "__main__":
    key = jax.random.PRNGKey(0)
    kx, kp = jax.random.split(key)

    B, in_ch, out_ch, H, W = 2, 4, 8, 16, 16
    x = jax.random.normal(kx, (B, in_ch, H, W), jnp.float32)          # NCHW
    params = init_double_conv_params(kp, in_ch, out_ch)

    out = jax.block_until_ready(double_conv_forward(params, x))
    ref = jax.block_until_ready(ref_forward(params, x))

    assert out.shape == (B, out_ch, H, W), out.shape
    np.testing.assert_allclose(np.asarray(out), np.asarray(ref), rtol=2e-2, atol=2e-2)
    print("KERNEL_OK")
</pallas_src>

<mosaic_0001>
module attributes {stable_mosaic.version = 11 : i64} {
  func.func @_matmul_bn_relu_kernel(%arg0: i32, %arg1: memref<256x72xbf16, #tpu.memory_space<vmem>>, %arg2: memref<72x128xbf16, #tpu.memory_space<vmem>>, %arg3: memref<1x128xf32, #tpu.memory_space<vmem>>, %arg4: memref<1x128xf32, #tpu.memory_space<vmem>>, %arg5: memref<256x128xbf16, #tpu.memory_space<vmem>>) attributes {dimension_semantics = [#tpu.dimension_semantics<parallel>], iteration_bounds = array<i64: 2>, scalar_prefetch = 0 : i64, scratch_operands = 0 : i64, tpu.core_type = #tpu.core_type<tc>, window_params = [{transform_indices = @transform_0, window_bounds = array<i64: 256, 72>}, {pipeline_mode = #tpu.pipeline_mode<synchronous>, transform_indices = @transform_1, window_bounds = array<i64: 72, 128>}, {pipeline_mode = #tpu.pipeline_mode<synchronous>, transform_indices = @transform_2, window_bounds = array<i64: 1, 128>}, {pipeline_mode = #tpu.pipeline_mode<synchronous>, transform_indices = @transform_3, window_bounds = array<i64: 1, 128>}, {transform_indices = @transform_4, window_bounds = array<i64: 256, 128>}]} {
    %c0 = arith.constant 0 : index
    %c0_0 = arith.constant 0 : index
    %0 = vector.load %arg1[%c0, %c0_0] : memref<256x72xbf16, #tpu.memory_space<vmem>>, vector<256x72xbf16>
    %c0_1 = arith.constant 0 : index
    %c0_2 = arith.constant 0 : index
    %1 = vector.load %arg2[%c0_1, %c0_2] : memref<72x128xbf16, #tpu.memory_space<vmem>>, vector<72x128xbf16>
    %cst = arith.constant dense<0.000000e+00> : vector<256x128xf32>
    %2 = tpu.matmul %0, %1, %cst {dimension_numbers = #tpu.dot_dimension_numbers<[1], [0], [0], [1], [0, 0, 1, 1], [], []>} : vector<256x72xbf16>, vector<72x128xbf16>, vector<256x128xf32> -> vector<256x128xf32>
    %c0_3 = arith.constant 0 : index
    %c0_4 = arith.constant 0 : index
    %3 = vector.load %arg3[%c0_3, %c0_4] : memref<1x128xf32, #tpu.memory_space<vmem>>, vector<1x128xf32>
    %4 = vector.broadcast %3 : vector<1x128xf32> to vector<256x128xf32>
    %5 = arith.mulf %2, %4 : vector<256x128xf32>
    %c0_5 = arith.constant 0 : index
    %c0_6 = arith.constant 0 : index
    %6 = vector.load %arg4[%c0_5, %c0_6] : memref<1x128xf32, #tpu.memory_space<vmem>>, vector<1x128xf32>
    %7 = vector.broadcast %6 : vector<1x128xf32> to vector<256x128xf32>
    %8 = arith.addf %5, %7 : vector<256x128xf32>
    %cst_7 = arith.constant 0.000000e+00 : f32
    %9 = vector.broadcast %cst_7 : f32 to vector<256x128xf32>
    %10 = arith.maximumf %8, %9 : vector<256x128xf32>
    %11 = arith.truncf %10 : vector<256x128xf32> to vector<256x128xbf16>
    %c0_8 = arith.constant 0 : index
    %c0_9 = arith.constant 0 : index
    %12 = vector.load %arg5[%c0_8, %c0_9] : memref<256x128xbf16, #tpu.memory_space<vmem>>, vector<256x128xbf16>
    tpu.vector_store %arg5[%c0_8, %c0_9], %11 {strides = array<i32>} : memref<256x128xbf16, #tpu.memory_space<vmem>>, vector<256x128xbf16>,
    return
  }
  func.func @transform_0(%arg0: i32) -> (i32, i32) {
    %c0_i32 = arith.constant 0 : i32
    %c0_i32_0 = arith.constant 0 : i32
    return %arg0, %c0_i32 : i32, i32
  }
  func.func @transform_1(%arg0: i32) -> (i32, i32) {
    %c0_i32 = arith.constant 0 : i32
    %c0_i32_0 = arith.constant 0 : i32
    %c0_i32_1 = arith.constant 0 : i32
    return %c0_i32, %c0_i32_0 : i32, i32
  }
  func.func @transform_2(%arg0: i32) -> (i32, i32) {
    %c0_i32 = arith.constant 0 : i32
    %c0_i32_0 = arith.constant 0 : i32
    %c0_i32_1 = arith.constant 0 : i32
    return %c0_i32, %c0_i32_0 : i32, i32
  }
  func.func @transform_3(%arg0: i32) -> (i32, i32) {
    %c0_i32 = arith.constant 0 : i32
    %c0_i32_0 = arith.constant 0 : i32
    %c0_i32_1 = arith.constant 0 : i32
    return %c0_i32, %c0_i32_0 : i32, i32
  }
  func.func @transform_4(%arg0: i32) -> (i32, i32) {
    %c0_i32 = arith.constant 0 : i32
    %c0_i32_0 = arith.constant 0 : i32
    return %arg0, %c0_i32 : i32, i32
  }
}

</mosaic_0001>

<bundles_post_ra>
// kernel: tpu_custom_call.1
= control target key start
LH: loop header
LB: loop body
LE: loop exit
PB: predicated region body
PF: predicated region fallthrough
CT: control target
= control target key end

     0   :  { %9 = vsyncpa [#allocation3], 0  ;;  %s1593_s0 = inlined_call_operand.vmem [shape: bf16[512,72], index: 0, kind: input, shape index: {}]   ;;  %s1594_s1 = inlined_call_operand.vmem [shape: bf16[72,128], index: 1, kind: input, shape index: {}]   ;;  %s1595_s2 = inlined_call_operand.vmem [shape: f32[1,128], index: 2, kind: input, shape index: {}]   ;;  %s1596_s3 = inlined_call_operand.vmem [shape: f32[1,128], index: 3, kind: input, shape index: {}]   ;;  %s1597_s4 = inlined_call_operand.hbm [shape: bf16[512,128], index: 4, kind: output, shape index: {}]  }
   0x1   :  { %11 = vsyncpa [#allocation3 + $0x1], 0  ;;  %s1346_s15 = smov 0   ;;  %s1348_s16 = smov 0  }
   0x2   :  { %s1350_s17 = smov 0   ;;  %s1352_s18 = smov 0  }
   0x3 LB: > { %s1367_s19 = sadd.s32 4294967295, %s1316_s18   ;;  %s908_s20 = sadd.s32 4294967294, %s1316_s18   ;;  %s1316_s18 = sphi %s1352_s18, %s1603_s18   ;;  %s1312_s17 = sphi %s1350_s17, %s1602_s17   ;;  %s1308_s16 = sphi %s1348_s16, %s1601_s16   ;;  %s1304_s15 = sphi %s1346_s15, %s1600_s15  }
   0x4   : > { %s1371_s21 = sadd.s32 1, %s1316_s18   ;;  %s113_s22 = sadd.s32 1, %s1312_s17 }
   0x5   : > { %s110_s23 = ssub.s32 %s1316_s18, %s1371_s21  ;;  %p123_p0 = scmp.ne.s32.totalorder %s1312_s17, %s1308_s16 }
   0x6   : > { %p111_p1 = scmp.eq.s32.totalorder %s110_s23, 0  ;;  %p124_p2 = scmp.eq.s32.totalorder %s1367_s19, 1 }
   0x7   : > { %p129_p3 = scmp.ne.s32.totalorder %s1308_s16, %s1304_s15  ;;  %p130_p4 = scmp.eq.s32.totalorder %s908_s20, 1 }
   0x8   : > { %s1382_s24 = scalar_select %p111_p1, %s1312_s17, %s113_s22  }
   0x9   : > { %p1384_p5 = por %p124_p2, %p123_p0  ;;  %p1388_p6 = por %p130_p4, %p129_p3 }
   0xa   : > { %p911_p7 = scmp.ge.s32.totalorder %s1316_s18, 1  ;;  %p166_p8 = scmp.lt.s32.totalorder %s1316_s18, 3 }
   0xc   : > { %p167_p9 = pnand %p911_p7, %p166_p8 }
   0xd   : > { %s913_s5 = sshll.u32 (!%p167_p9), %s1367_s19, 5  ;;  %s189_s29 = sand.u32 (!%p167_p9), 1, %s1308_s16  }
   0xe   : > { %170 = sbr.rel (%p167_p9) target bundleno = 285 (0x11d), region = 36  ;;  %p193_p10 = scmp.lt.s32.totalorder (!%p167_p9), %s913_s5, 63 }
   0xf   : > { %s912_s30 = sshll.u32 (!%p167_p9), %s189_s29, 7  ;;  %s1023_s6 = sshll.u32 (!%p167_p9), %s1367_s19, 11 }
  0x10   : > { %s1543_s19 = scalar_lea.hbm (!%p167_p9), %s1597_s4, %s1023_s6  ;;  %s1318_s12 = smov (!%p167_p9), [#allocation2]  }
  0x13   : > { %v1235_v0 = vld [vmem:[%s1594_s1 + $0x20] ss:$0 sps:$4 sm:$0xff]   ;;  %vm397_vm0 = vcmask 1043456   ;;  %v1236_v1 = vld [vmem:[%s1594_s1 + $0x18] sm:$0xff]   ;;  %v1237_v3 = vld [vmem:[%s1594_s1 + $0x10] sm:$0xff]   ;;  %s1605_s5 = smov (!%p193_p10, %s913_s5), 63 }
  0x14   : > { %1192 = vmatprep.subr.msk.bf16.mxu0 %vm397_vm0, %v1235_v0  ;;  %1193 = vmatprep.subr.msk.bf16.mxu1 %vm397_vm0, %v1235_v0  ;;  %v399_v2 = vsel %vm397_vm0, %v1235_v0, 0  ;;  %v1238_v4 = vld [vmem:[%s1594_s1 + $0x8] sm:$0xff]   ;;  %s914_s10 = sshll.u32 %s1605_s5, 2  ;;  %vm348_vm1 = vcmask 588800   ;;  %v1239_v7 = vld [vmem:[%s1594_s1] sm:$0xff]   ;;  %s1480_s5 = scalar_lea.vmem [#allocation2], %s912_s30 }
  0x15   : > { %1141 = vmatpush3.bf16.msra.mxu0 %v399_v2  ;;  %1187 = vmatpush3.bf16.msra.mxu1 %v399_v2  ;;  %s1410_s13 = scalar_lea.vmem %s1593_s0, %s914_s10  ;;  %v1450_v22 = vld [vmem:[%s1595_s2] ss:$0 sm:$0xff]  ;;  %s846_s7 = sshll.u32 %s1480_s5, 4  ;;  %s1545_s7 = int_to_ptr.vmem [resolvable:$true] %s846_s7 }
  0x16   : > { %1142 = vmatprep.subr.bf16.mxu0 %v1236_v1  ;;  %1183 = vmatprep.subr.bf16.mxu1 %v1236_v1  ;;  %v1240_v5 = vld [vmem:[%s1410_s13] sm:$0xff]   ;;  %v1242_v8 = vld [vmem:[%s1410_s13 + $0x8] sm:$0xff]   ;;  %v1244_v10 = vld [vmem:[%s1410_s13 + $0x10] sm:$0xff]   ;;  %s1553_s10 = scalar_lea.sflag [#allocation3], %s189_s29  ;;  %s1256_s11 = scalar_lea.vmem %s1545_s7, 2048 }
  0x17   : > { %v1241_v6 = vld [vmem:[%s1410_s13 + $0x40] sm:$0xff]   ;;  %1150 = vmatprep.mubr.msk.bf16.mxu0 %vm348_vm1, %v1240_v5  ;;  %v1243_v9 = vld [vmem:[%s1410_s13 + $0x48] sm:$0xff]   ;;  %v1245_v11 = vld [vmem:[%s1410_s13 + $0x50] sm:$0xff]   ;;  %p1257_p11 = scmp.ne.s32.totalorder %s1545_s7, %s1256_s11 }
  0x18   : > { %1166 = vmatprep.mubr.msk.bf16.mxu1 %vm348_vm1, %v1241_v6  ;;  %v1246_v12 = vld [vmem:[%s1410_s13 + $0x18] sm:$0xff]   ;;  %v1248_v14 = vld [vmem:[%s1410_s13 + $0x20] sm:$0xff]   ;;  %v1250_v16 = vld [vmem:[%s1410_s13 + $0x28] sm:$0xff]  }
  0x19   : > { %1143 = vmatpush3.bf16.msra.mxu0 %v1236_v1  ;;  %1188 = vmatpush3.bf16.msra.mxu1 %v1236_v1  ;;  %v1247_v13 = vld [vmem:[%s1410_s13 + $0x58] sm:$0xff]   ;;  %v1249_v15 = vld [vmem:[%s1410_s13 + $0x60] sm:$0xff]   ;;  %v1251_v17 = vld [vmem:[%s1410_s13 + $0x68] sm:$0xff]   ;;  %p1258_p12 = pnand %p1257_p11, %p1384_p5 }
  0x1a   : > { %1144 = vmatprep.subr.bf16.mxu0 %v1237_v3  ;;  %1184 = vmatprep.subr.bf16.mxu1 %v1237_v3  ;;  %v1252_v18 = vld [vmem:[%s1410_s13 + $0x30] sm:$0xff]   ;;  %v1254_v20 = vld [vmem:[%s1410_s13 + $0x38] sm:$0xff]   ;;  %v1457_v27 = vld [vmem:[%s1596_s3] ss:$0 sm:$0xff] }
  0x1b   : > { %v1253_v19 = vld [vmem:[%s1410_s13 + $0x70] sm:$0xff]   ;;  %v1255_v21 = vld [vmem:[%s1410_s13 + $0x78] sm:$0xff]   ;;  %p1259_p13 = pneg %p1258_p12  ;;  %s1260_s13 = sshll.u32 %s1318_s12, 4  ;;  %s1261_s13 = int_to_ptr.vmem [resolvable:$false] %s1260_s13 }
  0x1c   : > { %s1262_s14 = scalar_lea.vmem %s1261_s13, 4096  ;;  %p1263_p0 = scmp.lt.s32.totalorder %s1545_s7, %s1261_s13 }
  0x1d   : > { %1145 = vmatpush3.bf16.msra.mxu0 %v1237_v3  ;;  %1189 = vmatpush3.bf16.msra.mxu1 %v1237_v3  ;;  %p1264_p1 = scmp.lt.s32.totalorder %s1262_s14, %s1256_s11 }
  0x1e   : > { %1146 = vmatprep.subr.bf16.mxu0 %v1238_v4  ;;  %1185 = vmatprep.subr.bf16.mxu1 %v1238_v4 }
  0x1f   : > { %p1265_p2 = por %p1264_p1, %p1263_p0 }
  0x21   : > { %1147 = vmatpush3.bf16.msra.mxu0 %v1238_v4  ;;  %1190 = vmatpush3.bf16.msra.mxu1 %v1238_v4  ;;  %p1266_p3 = pnand %p1265_p2, %p1259_p13 }
  0x22   : > { %1148 = vmatprep.subr.bf16.mxu0 %v1239_v7  ;;  %1186 = vmatprep.subr.bf16.mxu1 %v1239_v7 }
  0x25   : > { %1149 = vmatpush3.bf16.msra.mxu0 %v1239_v7  ;;  %1191 = vmatpush3.bf16.msra.mxu1 %v1239_v7 }
  0x28   : > { %1151 = vmatmul.mubr.msk.bf16.vlgmr.msra.gmra.mxu0 %vm348_vm1, %v1242_v8  ;;  %1167 = vmatmul.mubr.msk.bf16.vlgmr.msra.gmra.mxu1 %vm348_vm1, %v1243_v9 }
  0x29   : > { %1154 = vmatprep.mubr.msk.bf16.mxu0 %vm348_vm1, %v1244_v10  ;;  %1170 = vmatprep.mubr.msk.bf16.mxu1 %vm348_vm1, %v1245_v11 }
  0x30   : > { %1155 = vmatmul.mubr.msk.bf16.gmra.mxu0 %vm348_vm1, %v1246_v12  ;;  %1171 = vmatmul.mubr.msk.bf16.gmra.mxu1 %vm348_vm1, %v1247_v13 }
  0x31   : > { %1158 = vmatprep.mubr.msk.bf16.mxu0 %vm348_vm1, %v1248_v14  ;;  %1174 = vmatprep.mubr.msk.bf16.mxu1 %vm348_vm1, %v1249_v15 }
  0x38   : > { %1159 = vmatmul.mubr.msk.bf16.gmra.mxu0 %vm348_vm1, %v1250_v16  ;;  %1175 = vmatmul.mubr.msk.bf16.gmra.mxu1 %vm348_vm1, %v1251_v17 }
  0x39   : > { %1162 = vmatprep.mubr.msk.bf16.mxu0 %vm348_vm1, %v1252_v18  ;;  %1178 = vmatprep.mubr.msk.bf16.mxu1 %vm348_vm1, %v1253_v19 }
  0x40   : > { %1163 = vmatmul.mubr.msk.bf16.gmra.mxu0 %vm348_vm1, %v1254_v20  ;;  %1179 = vmatmul.mubr.msk.bf16.gmra.mxu1 %vm348_vm1, %v1255_v21 }
  0xe8   : > { %v1152_v23 = vpop.f32.mrf.mxu0  ;;  %v1168_v24 = vpop.f32.mrf.mxu1 }
  0xe9   : > { %v571_v25 = vmul.f32 %v1152_v23, %v1450_v22  ;;  %v587_v26 = vmul.f32 %v1168_v24, %v1450_v22 }
  0xea   : > { %v435_v28 = vpop.f32.mrf.mxu0  ;;  %v499_v29 = vpop.f32.mrf.mxu1 }
  0xeb   : > { %v569_v30 = vmul.f32 %v1450_v22, %v435_v28  ;;  %v585_v31 = vmul.f32 %v1450_v22, %v499_v29  ;;  %v610_v34 = vadd.f32 %v1457_v27, %v571_v25  ;;  %v626_v35 = vadd.f32 %v1457_v27, %v587_v26 }
  0xec   : > { %v1153_v32 = vpop.f32.mrf.mxu0  ;;  %v1169_v33 = vpop.f32.mrf.mxu1 }
  0xed   : > { %v572_v36 = vmul.f32 %v1153_v32, %v1450_v22  ;;  %v588_v37 = vmul.f32 %v1169_v33, %v1450_v22  ;;  %v608_v40 = vadd.f32 %v1457_v27, %v569_v30  ;;  %v624_v41 = vadd.f32 %v1457_v27, %v585_v31 }
  0xee   : > { %v438_v38 = vpop.f32.mrf.mxu0  ;;  %v502_v39 = vpop.f32.mrf.mxu1  ;;  %v642_v48 = vmax.f32 %v610_v34, 0.0  ;;  %v658_v49 = vmax.f32 %v626_v35, 0.0 }
  0xef   : > { %v570_v42 = vmul.f32 %v1450_v22, %v438_v38  ;;  %v586_v43 = vmul.f32 %v1450_v22, %v502_v39  ;;  %v611_v44 = vadd.f32 %v1457_v27, %v572_v36  ;;  %v627_v45 = vadd.f32 %v1457_v27, %v588_v37 }
  0xf0   : > { %v1156_v46 = vpop.f32.mrf.mxu0  ;;  %v1172_v47 = vpop.f32.mrf.mxu1  ;;  %v640_v58 = vmax.f32 %v608_v40, 0.0  ;;  %v656_v59 = vmax.f32 %v624_v41, 0.0 }
  0xf1   : > { %v609_v50 = vadd.f32 %v1457_v27, %v570_v42  ;;  %v625_v51 = vadd.f32 %v1457_v27, %v586_v43  ;;  %v643_v52 = vmax.f32 %v611_v44, 0.0  ;;  %v659_v53 = vmax.f32 %v627_v45, 0.0 }
  0xf2   : > { %v575_v54 = vmul.f32 %v1156_v46, %v1450_v22  ;;  %v591_v55 = vmul.f32 %v1172_v47, %v1450_v22  ;;  %v451_v56 = vpop.f32.mrf.mxu0  ;;  %v515_v57 = vpop.f32.mrf.mxu1 }
  0xf3   : > { %v641_v60 = vmax.f32 %v609_v50, 0.0  ;;  %v657_v61 = vmax.f32 %v625_v51, 0.0  ;;  %v1032_v62 = vpack.c.bf16 %v643_v52, %v642_v48  ;;  %v1072_v63 = vpack.c.bf16 %v659_v53, %v658_v49 }
  0xf4   : > { %v573_v0 = vmul.f32 %v1450_v22, %v451_v56  ;;  %v589_v1 = vmul.f32 %v1450_v22, %v515_v57  ;;  %v1157_v2 = vpop.f32.mrf.mxu0  ;;  %v1173_v3 = vpop.f32.mrf.mxu1  ;;  %v614_v6 = vadd.f32 %v1457_v27, %v575_v54  ;;  %v630_v7 = vadd.f32 %v1457_v27, %v591_v55 }
  0xf5   : > { %v1027_v4 = vpack.c.bf16 %v641_v60, %v640_v58  ;;  %v1067_v5 = vpack.c.bf16 %v657_v61, %v656_v59  ;;  %1104 = vst [vmem:[%s1480_s5 + $0x8] sm:$0xff] %v1032_v62   ;;  %1112 = vst [vmem:[%s1480_s5 + $0x48] sm:$0xff] %v1072_v63   ;;  %v576_v8 = vmul.f32 %v1157_v2, %v1450_v22 }
  0xf6   : > { %v592_v9 = vmul.f32 %v1173_v3, %v1450_v22  ;;  %v454_v10 = vpop.f32.mrf.mxu0  ;;  %v518_v11 = vpop.f32.mrf.mxu1  ;;  %v612_v12 = vadd.f32 %v1457_v27, %v573_v0  ;;  %v628_v13 = vadd.f32 %v1457_v27, %v589_v1  ;;  %v646_v25 = vmax.f32 %v614_v6, 0.0 }
  0xf7   : > { %1028 = vst [vmem:[%s1480_s5] sm:$0xff] %v1027_v4   ;;  %1111 = vst [vmem:[%s1480_s5 + $0x40] sm:$0xff] %v1067_v5   ;;  %v574_v14 = vmul.f32 %v1450_v22, %v454_v10  ;;  %v590_v15 = vmul.f32 %v1450_v22, %v518_v11  ;;  %v615_v16 = vadd.f32 %v1457_v27, %v576_v8  ;;  %v662_v26 = vmax.f32 %v630_v7, 0.0 }
  0xf8   : > { %v631_v17 = vadd.f32 %v1457_v27, %v592_v9  ;;  %v1160_v18 = vpop.f32.mrf.mxu0  ;;  %v1176_v19 = vpop.f32.mrf.mxu1  ;;  %v644_v32 = vmax.f32 %v612_v12, 0.0  ;;  %v660_v33 = vmax.f32 %v628_v13, 0.0 }
  0xf9   : > { %v613_v20 = vadd.f32 %v1457_v27, %v574_v14  ;;  %v629_v21 = vadd.f32 %v1457_v27, %v590_v15  ;;  %v579_v23 = vmul.f32 %v1160_v18, %v1450_v22  ;;  %v595_v24 = vmul.f32 %v1176_v19, %v1450_v22 }
  0xfa   : > { %v647_v28 = vmax.f32 %v615_v16, 0.0  ;;  %v663_v29 = vmax.f32 %v631_v17, 0.0  ;;  %v467_v30 = vpop.f32.mrf.mxu0  ;;  %v531_v31 = vpop.f32.mrf.mxu1 }
  0xfb   : > { %v645_v34 = vmax.f32 %v613_v20, 0.0  ;;  %v661_v35 = vmax.f32 %v629_v21, 0.0  ;;  %v577_v38 = vmul.f32 %v1450_v22, %v467_v30  ;;  %v593_v39 = vmul.f32 %v1450_v22, %v531_v31 }
  0xfc   : > { %v1042_v36 = vpack.c.bf16 %v647_v28, %v646_v25  ;;  %v1082_v37 = vpack.c.bf16 %v663_v29, %v662_v26  ;;  %v1161_v40 = vpop.f32.mrf.mxu0  ;;  %v1177_v41 = vpop.f32.mrf.mxu1  ;;  %v618_v44 = vadd.f32 %v1457_v27, %v579_v23  ;;  %v634_v45 = vadd.f32 %v1457_v27, %v595_v24 }
  0xfd   : > { %v1037_v42 = vpack.c.bf16 %v645_v34, %v644_v32  ;;  %v1077_v43 = vpack.c.bf16 %v661_v35, %v660_v33  ;;  %v580_v46 = vmul.f32 %v1161_v40, %v1450_v22  ;;  %v596_v47 = vmul.f32 %v1177_v41, %v1450_v22 }
  0xfe   : > { %1106 = vst [vmem:[%s1480_s5 + $0x18] sm:$0xff] %v1042_v36   ;;  %1114 = vst [vmem:[%s1480_s5 + $0x58] sm:$0xff] %v1082_v37   ;;  %v470_v48 = vpop.f32.mrf.mxu0  ;;  %v534_v49 = vpop.f32.mrf.mxu1  ;;  %v616_v50 = vadd.f32 %v1457_v27, %v577_v38  ;;  %v632_v51 = vadd.f32 %v1457_v27, %v593_v39  ;;  %v650_v58 = vmax.f32 %v618_v44, 0.0  ;;  %v666_v59 = vmax.f32 %v634_v45, 0.0 }
  0xff   : > { %1105 = vst [vmem:[%s1480_s5 + $0x10] sm:$0xff] %v1037_v42   ;;  %1113 = vst [vmem:[%s1480_s5 + $0x50] sm:$0xff] %v1077_v43   ;;  %v578_v52 = vmul.f32 %v1450_v22, %v470_v48  ;;  %v594_v53 = vmul.f32 %v1450_v22, %v534_v49  ;;  %v619_v54 = vadd.f32 %v1457_v27, %v580_v46 }
 0x100   : > { %v635_v55 = vadd.f32 %v1457_v27, %v596_v47  ;;  %v1164_v56 = vpop.f32.mrf.mxu0  ;;  %v1180_v57 = vpop.f32.mrf.mxu1  ;;  %v648_v4 = vmax.f32 %v616_v50, 0.0  ;;  %v664_v5 = vmax.f32 %v632_v51, 0.0 }
 0x101   : > { %v617_v60 = vadd.f32 %v1457_v27, %v578_v52  ;;  %v633_v61 = vadd.f32 %v1457_v27, %v594_v53  ;;  %v651_v62 = vmax.f32 %v619_v54, 0.0  ;;  %v583_v0 = vmul.f32 %v1164_v56, %v1450_v22 }
 0x102   : > { %v667_v63 = vmax.f32 %v635_v55, 0.0  ;;  %v599_v1 = vmul.f32 %v1180_v57, %v1450_v22  ;;  %v483_v2 = vpop.f32.mrf.mxu0  ;;  %v547_v3 = vpop.f32.mrf.mxu1 }
 0x103   : > { %v649_v6 = vmax.f32 %v617_v60, 0.0  ;;  %v665_v7 = vmax.f32 %v633_v61, 0.0  ;;  %v1052_v8 = vpack.c.bf16 %v651_v62, %v650_v58  ;;  %v581_v10 = vmul.f32 %v1450_v22, %v483_v2 }
 0x104   : > { %v1092_v9 = vpack.c.bf16 %v667_v63, %v666_v59  ;;  %v597_v11 = vmul.f32 %v1450_v22, %v547_v3  ;;  %v1165_v12 = vpop.f32.mrf.mxu0  ;;  %v1181_v13 = vpop.f32.mrf.mxu1  ;;  %v622_v16 = vadd.f32 %v1457_v27, %v583_v0  ;;  %v638_v17 = vadd.f32 %v1457_v27, %v599_v1 }
 0x105   : > { %v1047_v14 = vpack.c.bf16 %v649_v6, %v648_v4  ;;  %v1087_v15 = vpack.c.bf16 %v665_v7, %v664_v5  ;;  %1108 = vst [vmem:[%s1480_s5 + $0x28] sm:$0xff] %v1052_v8   ;;  %v584_v18 = vmul.f32 %v1165_v12, %v1450_v22  ;;  %v600_v19 = vmul.f32 %v1181_v13, %v1450_v22 }
 0x106   : > { %1116 = vst [vmem:[%s1480_s5 + $0x68] sm:$0xff] %v1092_v9   ;;  %v486_v20 = vpop.f32.mrf.mxu0  ;;  %v550_v21 = vpop.f32.mrf.mxu1  ;;  %v620_v23 = vadd.f32 %v1457_v27, %v581_v10  ;;  %v636_v24 = vadd.f32 %v1457_v27, %v597_v11  ;;  %v654_v32 = vmax.f32 %v622_v16, 0.0  ;;  %v670_v33 = vmax.f32 %v638_v17, 0.0 }
 0x107   : > { %1107 = vst [vmem:[%s1480_s5 + $0x20] sm:$0xff] %v1047_v14   ;;  %1115 = vst [vmem:[%s1480_s5 + $0x60] sm:$0xff] %v1087_v15   ;;  %v582_v25 = vmul.f32 %v1450_v22, %v486_v20  ;;  %v598_v26 = vmul.f32 %v1450_v22, %v550_v21  ;;  %v623_v28 = vadd.f32 %v1457_v27, %v584_v18 }
 0x108   : > { %v639_v29 = vadd.f32 %v1457_v27, %v600_v19  ;;  %v652_v22 = vmax.f32 %v620_v23, 0.0  ;;  %v668_v36 = vmax.f32 %v636_v24, 0.0 }
 0x109   : > { %v621_v30 = vadd.f32 %v1457_v27, %v582_v25  ;;  %v637_v31 = vadd.f32 %v1457_v27, %v598_v26  ;;  %v655_v34 = vmax.f32 %v623_v28, 0.0 }
 0x10a   : > { %v671_v35 = vmax.f32 %v639_v29, 0.0 }
 0x10b   : > { %v653_v37 = vmax.f32 %v621_v30, 0.0  ;;  %v669_v38 = vmax.f32 %v637_v31, 0.0  ;;  %v1062_v39 = vpack.c.bf16 %v655_v34, %v654_v32 }
 0x10c   : > { %v1102_v40 = vpack.c.bf16 %v671_v35, %v670_v33 }
 0x10d   : > { %v1057_v27 = vpack.c.bf16 %v653_v37, %v652_v22  ;;  %v1097_v41 = vpack.c.bf16 %v669_v38, %v668_v36  ;;  %1110 = vst [vmem:[%s1480_s5 + $0x38] sm:$0xff] %v1062_v39  }
 0x10e   : > { %1118 = vst [vmem:[%s1480_s5 + $0x78] sm:$0xff] %v1102_v40  }
 0x10f   : > { %1109 = vst [vmem:[%s1480_s5 + $0x30] sm:$0xff] %v1057_v27   ;;  %1117 = vst [vmem:[%s1480_s5 + $0x70] sm:$0xff] %v1097_v41  }
 0x110   : > { %1269 = shalt.err (!%p1266_p3)
}
 0x111   : > { %s1270_s20 = scalar_lea.hbm %s1543_s19, 2048  ;;  %s1274_s27 = scalar_lea.hbm %s1597_s4, 4096 }
 0x112   : > { %p1271_p4 = scmp.ne.s32.totalorder %s1543_s19, %s1270_s20  ;;  %p1275_p9 = scmp.lt.s32.totalorder %s1543_s19, %s1597_s4 }
 0x113   : > { %p1276_p10 = scmp.lt.s32.totalorder %s1274_s27, %s1270_s20 }
 0x114   : > { %p1272_p7 = pnand %p1271_p4, %p1384_p5 }
 0x115   : > { %p1277_p11 = por %p1276_p10, %p1275_p9 }
 0x116   : > { %p1273_p8 = pneg %p1272_p7 }
 0x118   : > { %p1278_p12 = pnand %p1277_p11, %p1273_p8 }
 0x11a   : > { %1281 = shalt.err (!%p1278_p12)
}
 0x11b   : > { %s1319_s30 = smov 64   ;;  %s1320_s5 = smov 4  }
 0x11c   : > { %1194 = dma.vmem_to_hbm [thread:$0]  (%p1384_p5), %s1545_s7, 2048, %s1543_s19, %s1553_s10, %s1319_s30, %s1319_s30, %s1320_s5  }
 0x11d PF: > { %p1200_p13 = scmp.ge.s32.totalorder %s1316_s18, 2  ;;  %s861_s6 = sand.u32 1, %s1304_s15  }
 0x11e   : > { %s862_s8 = scalar_lea.sflag [#allocation3], %s861_s6 }
 0x11f   : > { %p1197_p0 = pnand %p1200_p13, %p1388_p6 }
 0x121   : > { %p1198_p1 = pneg %p1197_p0 }
 0x123   : > { %1299 = dma.done.wait (%p1198_p1), %s862_s8, 2048  }
 0x124   : > { %1301 = vsyncadd (%p1198_p1), %s862_s8, 4294965248  ;;  %p14_p2 = scmp.ge.s32.totalorder %s1371_s21, 4   ;;  %s1600_s15 = smov %s1308_s16 }
 0x125   : > { %s1601_s16 = smov %s1312_s17  ;;  %s1602_s17 = smov %s1382_s24 }
 0x126   : > { %s1603_s18 = smov %s1371_s21  ;;  %16 = sbr.rel (!%p14_p2) target bundleno = 3 (0x3), region = 71 }
 0x12b   :  { %867 = vsyncpa [#allocation3], 1 }
 0x12c   :  { %869 = vsyncpa [#allocation3 + $0x1], 1 }

</bundles_post_ra>
